<compile_context>
chip_gen: v7x
topology: tpu7x:2x2x1
jax: 0.10.0
libtpu: 0.0.40
codegen_flags: <defaults>
</compile_context>

<pallas_src>
import functools

import jax
import jax.numpy as jnp
from jax.experimental import pallas as pl
from jax.experimental.pallas import tpu as pltpu

EPS = 1e-5
LANE = 128
ROW_TILE_BF16 = 16  # bf16 packs 2 rows / sublane -> pad rows to 16


def _round_up(n, m):
    return ((n + m - 1) // m) * m


def mlp_kernel(x_ref, w_ref, b_ref, out_ref, *, n_rows):
    """Whole MLP forward in one gridless invocation (all resident in VMEM).

    x_ref:   [Np, Dp]     f32   rows padded to 16, features padded to 128
    w_ref:   [L,  Dp, Dp] bf16  pre-transposed (x @ W), BN gamma folded in
    b_ref:   [L,  1,  Dp] f32   BN beta folded in
    out_ref: [N,  D_out]  f32   exact (unpadded) output window
    """
    x = x_ref[...]                                   # f32 [Np, Dp]
    n_layers = w_ref.shape[0]
    np_rows, dp = x.shape
    inv_n = 1.0 / n_rows

    if np_rows != n_rows:
        row_ids = jax.lax.broadcasted_iota(jnp.int32, (np_rows, dp), 0)
        row_mask = (row_ids < n_rows).astype(jnp.float32)
    else:
        row_mask = None

    # Hidden layers: Linear -> ReLU -> BatchNorm1d (batch stats; gamma/beta
    # were folded into the following layer's weight/bias offline).
    for i in range(n_layers - 1):                    # static unroll (L constant)
        # MXU: bf16 inputs, f32 accumulation.
        h = jnp.dot(x.astype(jnp.bfloat16), w_ref[i],
                    preferred_element_type=jnp.float32) + b_ref[i]
        h = jnp.maximum(h, 0.0)                      # ReLU (VPU)
        if row_mask is not None:
            h = h * row_mask                         # keep padded rows out of stats

        # Two-pass batch stats (biased variance, like PyTorch training mode).
        mean = jnp.sum(h, axis=0, keepdims=True) * inv_n      # [1, Dp]
        c = h - mean
        if row_mask is not None:
            c = c * row_mask
        var = jnp.sum(c * c, axis=0, keepdims=True) * inv_n   # [1, Dp]
        x = c * jax.lax.rsqrt(var + EPS)             # EUP; padded rows stay 0

    # Last layer: Linear -> ReLU (no BN). Store only the valid window.
    h = jnp.dot(x.astype(jnp.bfloat16), w_ref[n_layers - 1],
                preferred_element_type=jnp.float32) + b_ref[n_layers - 1]
    h = jnp.maximum(h, 0.0)
    n_out, d_out = out_ref.shape
    out_ref[...] = h[:n_out, :d_out].astype(out_ref.dtype)


def prepare_params(ws, bs, gammas, betas):
    """One-time parameter prep (call once, reuse for every forward).

    * Folds BN_i's gamma/beta into Linear_{i+1}:
        W'_{i+1} = diag(gamma_i) @ W_{i+1},  b'_{i+1} = beta_i @ W_{i+1} + b_{i+1}
    * Zero-pads features to a multiple of 128 lanes.
    * Stacks all L weights into one bf16 [L, Dp, Dp] tensor and all biases
      into one f32 [L, 1, Dp] tensor (3 kernel operands total, incl. x).
    """
    L = len(ws)
    d_in = ws[0].shape[0]
    d_out = ws[-1].shape[1]
    dp = _round_up(max(d_in, d_out), LANE)

    folded_ws, folded_bs = [ws[0]], [bs[0]]
    for i in range(1, L):
        g, bt = gammas[i - 1], betas[i - 1]
        folded_ws.append(g[:, None] * ws[i])
        folded_bs.append(bt @ ws[i] + bs[i])

    w_stack = jnp.stack(
        [jnp.pad(w, ((0, dp - w.shape[0]), (0, dp - w.shape[1])))
         for w in folded_ws], axis=0).astype(jnp.bfloat16)       # [L, Dp, Dp]
    b_stack = jnp.stack(
        [jnp.pad(b, (0, dp - b.shape[0]))[None, :]
         for b in folded_bs], axis=0).astype(jnp.float32)        # [L, 1, Dp]
    return jax.device_put(w_stack), jax.device_put(b_stack), d_out


@functools.partial(jax.jit, static_argnames=("d_out",))
def mlp_forward(x, w_stack, b_stack, d_out):
    """Pads x (rows->16, lanes->Dp) and runs the whole MLP in one kernel."""
    n, d_in = x.shape
    dp = w_stack.shape[-1]
    np_rows = _round_up(n, ROW_TILE_BF16)
    x_p = jnp.pad(x.astype(jnp.float32),
                  ((0, np_rows - n), (0, dp - d_in)))

    kernel = functools.partial(mlp_kernel, n_rows=n)
    return pl.pallas_call(
        kernel,
        out_shape=jax.ShapeDtypeStruct((n, d_out), jnp.float32),
        in_specs=[pl.BlockSpec(memory_space=pltpu.MemorySpace.VMEM)] * 3,
        out_specs=pl.BlockSpec(memory_space=pltpu.MemorySpace.VMEM),
        compiler_params=pltpu.CompilerParams(vmem_limit_bytes=4 << 20),
    )(x_p, w_stack, b_stack)


def init_params(key, dim_in, dim_out, num_gc_layers):
    """PyTorch-style Linear init U(-1/sqrt(fan_in), 1/sqrt(fan_in)); BN
    gamma/beta perturbed from their defaults so the offline folding path is
    actually exercised (forward formula is unchanged)."""
    ws, bs, gammas, betas = [], [], [], []
    bound = 1.0 / jnp.sqrt(jnp.float32(dim_in))
    for i in range(num_gc_layers):
        d_o = dim_out if i == num_gc_layers - 1 else dim_in
        key, kw, kb = jax.random.split(key, 3)
        # PyTorch Linear weight is [d_o, d_in]; store transposed [d_in, d_o].
        ws.append(jax.random.uniform(kw, (dim_in, d_o), jnp.float32, -bound, bound))
        bs.append(jax.random.uniform(kb, (d_o,), jnp.float32, -bound, bound))
        if i < num_gc_layers - 1:
            key, kg, kt = jax.random.split(key, 3)
            gammas.append(1.0 + 0.1 * jax.random.normal(kg, (dim_in,), jnp.float32))
            betas.append(0.1 * jax.random.normal(kt, (dim_in,), jnp.float32))
    return ws, bs, gammas, betas


def mlp_reference(x, ws, bs, gammas, betas):
    """Pure-JAX reference of the PyTorch training-mode forward, with the same
    bf16 MXU-input precision as the kernel (f32 accumulation)."""
    h = x.astype(jnp.float32)
    L = len(ws)
    for i in range(L):
        h = jnp.dot(h.astype(jnp.bfloat16), ws[i].astype(jnp.bfloat16),
                    preferred_element_type=jnp.float32) + bs[i]
        h = jnp.maximum(h, 0.0)
        if i < L - 1:
            mean = jnp.mean(h, axis=0, keepdims=True)
            var = jnp.mean((h - mean) ** 2, axis=0, keepdims=True)
            h = gammas[i] * (h - mean) / jnp.sqrt(var + EPS) + betas[i]
    return h


if __name__ == "__main__":
    key = jax.random.PRNGKey(0)
    dim_in, dim_out, num_gc_layers = 32, 32, 5
    n_nodes = 8

    k_x, k_p = jax.random.split(key)
    x = jax.random.normal(k_x, (n_nodes, dim_in), jnp.float32)
    # edge_index / batch exist in the PyTorch signature but are unused by forward.
    edge_index = jnp.zeros((2, 16), jnp.int32)
    batch = jnp.zeros((n_nodes,), jnp.int32)

    ws, bs, gammas, betas = init_params(k_p, dim_in, dim_out, num_gc_layers)
    # One-time prep: pad, fold BN, cast to bf16, stack -> 3 kernel operands.
    w_stack, b_stack, d_out = prepare_params(ws, bs, gammas, betas)

    out = jax.block_until_ready(mlp_forward(x, w_stack, b_stack, d_out))
    ref = mlp_reference(x, ws, bs, gammas, betas)

    assert out.shape == (n_nodes, dim_out)
    # bf16 MXU inputs -> compare against a bf16-matched reference.
    assert jnp.allclose(out, ref, atol=2e-2, rtol=2e-2), "mismatch vs reference"
    print("KERNEL_OK")
</pallas_src>

<mosaic_0001>
module attributes {stable_mosaic.version = 11 : i64} {
  func.func @mlp_kernel(%arg0: memref<16x128xf32, #tpu.memory_space<vmem>>, %arg1: memref<5x128x128xbf16, #tpu.memory_space<vmem>>, %arg2: memref<5x1x128xf32, #tpu.memory_space<vmem>>, %arg3: memref<8x32xf32, #tpu.memory_space<vmem>>) attributes {dimension_semantics = [], scalar_prefetch = 0 : i64, scratch_operands = 0 : i64, tpu.core_type = #tpu.core_type<tc>} {
    %c0 = arith.constant 0 : index
    %c0_0 = arith.constant 0 : index
    %0 = vector.load %arg0[%c0, %c0_0] : memref<16x128xf32, #tpu.memory_space<vmem>>, vector<16x128xf32>
    %1 = tpu.iota {dimensions = array<i32: 0>} : vector<16x128xi32>
    %c8_i32 = arith.constant 8 : i32
    %2 = vector.broadcast %c8_i32 : i32 to vector<16x128xi32>
    %3 = arith.cmpi slt, %1, %2 : vector<16x128xi32>
    %4 = arith.extui %3 : vector<16x128xi1> to vector<16x128xi32>
    %5 = arith.sitofp %4 : vector<16x128xi32> to vector<16x128xf32>
    %6 = arith.truncf %0 : vector<16x128xf32> to vector<16x128xbf16>
    %c0_1 = arith.constant 0 : index
    %c0_2 = arith.constant 0 : index
    %c0_3 = arith.constant 0 : index
    %7 = vector.load %arg1[%c0_1, %c0_2, %c0_3] : memref<5x128x128xbf16, #tpu.memory_space<vmem>>, vector<1x128x128xbf16>
    %8 = vector.shape_cast %7 : vector<1x128x128xbf16> to vector<128x128xbf16>
    %cst = arith.constant dense<0.000000e+00> : vector<16x128xf32>
    %9 = tpu.matmul %6, %8, %cst {dimension_numbers = #tpu.dot_dimension_numbers<[1], [0], [0], [1], [0, 0, 1, 1], [], []>} : vector<16x128xbf16>, vector<128x128xbf16>, vector<16x128xf32> -> vector<16x128xf32>
    %c0_4 = arith.constant 0 : index
    %c0_5 = arith.constant 0 : index
    %c0_6 = arith.constant 0 : index
    %10 = vector.load %arg2[%c0_4, %c0_5, %c0_6] : memref<5x1x128xf32, #tpu.memory_space<vmem>>, vector<1x1x128xf32>
    %11 = vector.shape_cast %10 : vector<1x1x128xf32> to vector<1x128xf32>
    %12 = vector.broadcast %11 : vector<1x128xf32> to vector<16x128xf32>
    %13 = arith.addf %9, %12 : vector<16x128xf32>
    %cst_7 = arith.constant 0.000000e+00 : f32
    %14 = vector.broadcast %cst_7 : f32 to vector<16x128xf32>
    %15 = arith.maximumf %13, %14 : vector<16x128xf32>
    %16 = arith.mulf %15, %5 : vector<16x128xf32>
    %cst_8 = arith.constant dense<0.000000e+00> : vector<128xf32>
    %17 = vector.multi_reduction <add>, %16, %cst_8 [0] : vector<16x128xf32> to vector<128xf32>
    %18 = vector.shape_cast %17 : vector<128xf32> to vector<1x128xf32>
    %cst_9 = arith.constant 1.250000e-01 : f32
    %19 = vector.broadcast %cst_9 : f32 to vector<1x128xf32>
    %20 = arith.mulf %18, %19 : vector<1x128xf32>
    %21 = vector.broadcast %20 : vector<1x128xf32> to vector<16x128xf32>
    %22 = arith.subf %16, %21 : vector<16x128xf32>
    %23 = arith.mulf %22, %5 : vector<16x128xf32>
    %24 = arith.mulf %23, %23 : vector<16x128xf32>
    %cst_10 = arith.constant dense<0.000000e+00> : vector<128xf32>
    %25 = vector.multi_reduction <add>, %24, %cst_10 [0] : vector<16x128xf32> to vector<128xf32>
    %26 = vector.shape_cast %25 : vector<128xf32> to vector<1x128xf32>
    %cst_11 = arith.constant 1.250000e-01 : f32
    %27 = vector.broadcast %cst_11 : f32 to vector<1x128xf32>
    %28 = arith.mulf %26, %27 : vector<1x128xf32>
    %cst_12 = arith.constant 9.99999974E-6 : f32
    %29 = vector.broadcast %cst_12 : f32 to vector<1x128xf32>
    %30 = arith.addf %28, %29 : vector<1x128xf32>
    %31 = math.rsqrt %30 : vector<1x128xf32>
    %32 = vector.broadcast %31 : vector<1x128xf32> to vector<16x128xf32>
    %33 = arith.mulf %23, %32 : vector<16x128xf32>
    %34 = arith.truncf %33 : vector<16x128xf32> to vector<16x128xbf16>
    %c1 = arith.constant 1 : index
    %c0_13 = arith.constant 0 : index
    %c0_14 = arith.constant 0 : index
    %35 = vector.load %arg1[%c1, %c0_13, %c0_14] : memref<5x128x128xbf16, #tpu.memory_space<vmem>>, vector<1x128x128xbf16>
    %36 = vector.shape_cast %35 : vector<1x128x128xbf16> to vector<128x128xbf16>
    %cst_15 = arith.constant dense<0.000000e+00> : vector<16x128xf32>
    %37 = tpu.matmul %34, %36, %cst_15 {dimension_numbers = #tpu.dot_dimension_numbers<[1], [0], [0], [1], [0, 0, 1, 1], [], []>} : vector<16x128xbf16>, vector<128x128xbf16>, vector<16x128xf32> -> vector<16x128xf32>
    %c1_16 = arith.constant 1 : index
    %c0_17 = arith.constant 0 : index
    %c0_18 = arith.constant 0 : index
    %38 = vector.load %arg2[%c1_16, %c0_17, %c0_18] : memref<5x1x128xf32, #tpu.memory_space<vmem>>, vector<1x1x128xf32>
    %39 = vector.shape_cast %38 : vector<1x1x128xf32> to vector<1x128xf32>
    %40 = vector.broadcast %39 : vector<1x128xf32> to vector<16x128xf32>
    %41 = arith.addf %37, %40 : vector<16x128xf32>
    %cst_19 = arith.constant 0.000000e+00 : f32
    %42 = vector.broadcast %cst_19 : f32 to vector<16x128xf32>
    %43 = arith.maximumf %41, %42 : vector<16x128xf32>
    %44 = arith.mulf %43, %5 : vector<16x128xf32>
    %cst_20 = arith.constant dense<0.000000e+00> : vector<128xf32>
    %45 = vector.multi_reduction <add>, %44, %cst_20 [0] : vector<16x128xf32> to vector<128xf32>
    %46 = vector.shape_cast %45 : vector<128xf32> to vector<1x128xf32>
    %cst_21 = arith.constant 1.250000e-01 : f32
    %47 = vector.broadcast %cst_21 : f32 to vector<1x128xf32>
    %48 = arith.mulf %46, %47 : vector<1x128xf32>
    %49 = vector.broadcast %48 : vector<1x128xf32> to vector<16x128xf32>
    %50 = arith.subf %44, %49 : vector<16x128xf32>
    %51 = arith.mulf %50, %5 : vector<16x128xf32>
    %52 = arith.mulf %51, %51 : vector<16x128xf32>
    %cst_22 = arith.constant dense<0.000000e+00> : vector<128xf32>
    %53 = vector.multi_reduction <add>, %52, %cst_22 [0] : vector<16x128xf32> to vector<128xf32>
    %54 = vector.shape_cast %53 : vector<128xf32> to vector<1x128xf32>
    %cst_23 = arith.constant 1.250000e-01 : f32
    %55 = vector.broadcast %cst_23 : f32 to vector<1x128xf32>
    %56 = arith.mulf %54, %55 : vector<1x128xf32>
    %cst_24 = arith.constant 9.99999974E-6 : f32
    %57 = vector.broadcast %cst_24 : f32 to vector<1x128xf32>
    %58 = arith.addf %56, %57 : vector<1x128xf32>
    %59 = math.rsqrt %58 : vector<1x128xf32>
    %60 = vector.broadcast %59 : vector<1x128xf32> to vector<16x128xf32>
    %61 = arith.mulf %51, %60 : vector<16x128xf32>
    %62 = arith.truncf %61 : vector<16x128xf32> to vector<16x128xbf16>
    %c2 = arith.constant 2 : index
    %c0_25 = arith.constant 0 : index
    %c0_26 = arith.constant 0 : index
    %63 = vector.load %arg1[%c2, %c0_25, %c0_26] : memref<5x128x128xbf16, #tpu.memory_space<vmem>>, vector<1x128x128xbf16>
    %64 = vector.shape_cast %63 : vector<1x128x128xbf16> to vector<128x128xbf16>
    %cst_27 = arith.constant dense<0.000000e+00> : vector<16x128xf32>
    %65 = tpu.matmul %62, %64, %cst_27 {dimension_numbers = #tpu.dot_dimension_numbers<[1], [0], [0], [1], [0, 0, 1, 1], [], []>} : vector<16x128xbf16>, vector<128x128xbf16>, vector<16x128xf32> -> vector<16x128xf32>
    %c2_28 = arith.constant 2 : index
    %c0_29 = arith.constant 0 : index
    %c0_30 = arith.constant 0 : index
    %66 = vector.load %arg2[%c2_28, %c0_29, %c0_30] : memref<5x1x128xf32, #tpu.memory_space<vmem>>, vector<1x1x128xf32>
    %67 = vector.shape_cast %66 : vector<1x1x128xf32> to vector<1x128xf32>
    %68 = vector.broadcast %67 : vector<1x128xf32> to vector<16x128xf32>
    %69 = arith.addf %65, %68 : vector<16x128xf32>
    %cst_31 = arith.constant 0.000000e+00 : f32
    %70 = vector.broadcast %cst_31 : f32 to vector<16x128xf32>
    %71 = arith.maximumf %69, %70 : vector<16x128xf32>
    %72 = arith.mulf %71, %5 : vector<16x128xf32>
    %cst_32 = arith.constant dense<0.000000e+00> : vector<128xf32>
    %73 = vector.multi_reduction <add>, %72, %cst_32 [0] : vector<16x128xf32> to vector<128xf32>
    %74 = vector.shape_cast %73 : vector<128xf32> to vector<1x128xf32>
    %cst_33 = arith.constant 1.250000e-01 : f32
    %75 = vector.broadcast %cst_33 : f32 to vector<1x128xf32>
    %76 = arith.mulf %74, %75 : vector<1x128xf32>
    %77 = vector.broadcast %76 : vector<1x128xf32> to vector<16x128xf32>
    %78 = arith.subf %72, %77 : vector<16x128xf32>
    %79 = arith.mulf %78, %5 : vector<16x128xf32>
    %80 = arith.mulf %79, %79 : vector<16x128xf32>
    %cst_34 = arith.constant dense<0.000000e+00> : vector<128xf32>
    %81 = vector.multi_reduction <add>, %80, %cst_34 [0] : vector<16x128xf32> to vector<128xf32>
    %82 = vector.shape_cast %81 : vector<128xf32> to vector<1x128xf32>
    %cst_35 = arith.constant 1.250000e-01 : f32
    %83 = vector.broadcast %cst_35 : f32 to vector<1x128xf32>
    %84 = arith.mulf %82, %83 : vector<1x128xf32>
    %cst_36 = arith.constant 9.99999974E-6 : f32
    %85 = vector.broadcast %cst_36 : f32 to vector<1x128xf32>
    %86 = arith.addf %84, %85 : vector<1x128xf32>
    %87 = math.rsqrt %86 : vector<1x128xf32>
    %88 = vector.broadcast %87 : vector<1x128xf32> to vector<16x128xf32>
    %89 = arith.mulf %79, %88 : vector<16x128xf32>
    %90 = arith.truncf %89 : vector<16x128xf32> to vector<16x128xbf16>
    %c3 = arith.constant 3 : index
    %c0_37 = arith.constant 0 : index
    %c0_38 = arith.constant 0 : index
    %91 = vector.load %arg1[%c3, %c0_37, %c0_38] : memref<5x128x128xbf16, #tpu.memory_space<vmem>>, vector<1x128x128xbf16>
    %92 = vector.shape_cast %91 : vector<1x128x128xbf16> to vector<128x128xbf16>
    %cst_39 = arith.constant dense<0.000000e+00> : vector<16x128xf32>
    %93 = tpu.matmul %90, %92, %cst_39 {dimension_numbers = #tpu.dot_dimension_numbers<[1], [0], [0], [1], [0, 0, 1, 1], [], []>} : vector<16x128xbf16>, vector<128x128xbf16>, vector<16x128xf32> -> vector<16x128xf32>
    %c3_40 = arith.constant 3 : index
    %c0_41 = arith.constant 0 : index
    %c0_42 = arith.constant 0 : index
    %94 = vector.load %arg2[%c3_40, %c0_41, %c0_42] : memref<5x1x128xf32, #tpu.memory_space<vmem>>, vector<1x1x128xf32>
    %95 = vector.shape_cast %94 : vector<1x1x128xf32> to vector<1x128xf32>
    %96 = vector.broadcast %95 : vector<1x128xf32> to vector<16x128xf32>
    %97 = arith.addf %93, %96 : vector<16x128xf32>
    %cst_43 = arith.constant 0.000000e+00 : f32
    %98 = vector.broadcast %cst_43 : f32 to vector<16x128xf32>
    %99 = arith.maximumf %97, %98 : vector<16x128xf32>
    %100 = arith.mulf %99, %5 : vector<16x128xf32>
    %cst_44 = arith.constant dense<0.000000e+00> : vector<128xf32>
    %101 = vector.multi_reduction <add>, %100, %cst_44 [0] : vector<16x128xf32> to vector<128xf32>
    %102 = vector.shape_cast %101 : vector<128xf32> to vector<1x128xf32>
    %cst_45 = arith.constant 1.250000e-01 : f32
    %103 = vector.broadcast %cst_45 : f32 to vector<1x128xf32>
    %104 = arith.mulf %102, %103 : vector<1x128xf32>
    %105 = vector.broadcast %104 : vector<1x128xf32> to vector<16x128xf32>
    %106 = arith.subf %100, %105 : vector<16x128xf32>
    %107 = arith.mulf %106, %5 : vector<16x128xf32>
    %108 = arith.mulf %107, %107 : vector<16x128xf32>
    %cst_46 = arith.constant dense<0.000000e+00> : vector<128xf32>
    %109 = vector.multi_reduction <add>, %108, %cst_46 [0] : vector<16x128xf32> to vector<128xf32>
    %110 = vector.shape_cast %109 : vector<128xf32> to vector<1x128xf32>
    %cst_47 = arith.constant 1.250000e-01 : f32
    %111 = vector.broadcast %cst_47 : f32 to vector<1x128xf32>
    %112 = arith.mulf %110, %111 : vector<1x128xf32>
    %cst_48 = arith.constant 9.99999974E-6 : f32
    %113 = vector.broadcast %cst_48 : f32 to vector<1x128xf32>
    %114 = arith.addf %112, %113 : vector<1x128xf32>
    %115 = math.rsqrt %114 : vector<1x128xf32>
    %116 = vector.broadcast %115 : vector<1x128xf32> to vector<16x128xf32>
    %117 = arith.mulf %107, %116 : vector<16x128xf32>
    %118 = arith.truncf %117 : vector<16x128xf32> to vector<16x128xbf16>
    %c4 = arith.constant 4 : index
    %c0_49 = arith.constant 0 : index
    %c0_50 = arith.constant 0 : index
    %119 = vector.load %arg1[%c4, %c0_49, %c0_50] : memref<5x128x128xbf16, #tpu.memory_space<vmem>>, vector<1x128x128xbf16>
    %120 = vector.shape_cast %119 : vector<1x128x128xbf16> to vector<128x128xbf16>
    %cst_51 = arith.constant dense<0.000000e+00> : vector<16x128xf32>
    %121 = tpu.matmul %118, %120, %cst_51 {dimension_numbers = #tpu.dot_dimension_numbers<[1], [0], [0], [1], [0, 0, 1, 1], [], []>} : vector<16x128xbf16>, vector<128x128xbf16>, vector<16x128xf32> -> vector<16x128xf32>
    %c4_52 = arith.constant 4 : index
    %c0_53 = arith.constant 0 : index
    %c0_54 = arith.constant 0 : index
    %122 = vector.load %arg2[%c4_52, %c0_53, %c0_54] : memref<5x1x128xf32, #tpu.memory_space<vmem>>, vector<1x1x128xf32>
    %123 = vector.shape_cast %122 : vector<1x1x128xf32> to vector<1x128xf32>
    %124 = vector.broadcast %123 : vector<1x128xf32> to vector<16x128xf32>
    %125 = arith.addf %121, %124 : vector<16x128xf32>
    %cst_55 = arith.constant 0.000000e+00 : f32
    %126 = vector.broadcast %cst_55 : f32 to vector<16x128xf32>
    %127 = arith.maximumf %125, %126 : vector<16x128xf32>
    %128 = vector.extract_strided_slice %127 {offsets = [0, 0], sizes = [8, 32], strides = [1, 1]} : vector<16x128xf32> to vector<8x32xf32>
    %c0_56 = arith.constant 0 : index
    %c0_57 = arith.constant 0 : index
    %129 = vector.load %arg3[%c0_56, %c0_57] : memref<8x32xf32, #tpu.memory_space<vmem>>, vector<8x32xf32>
    tpu.vector_store %arg3[%c0_56, %c0_57], %128 {strides = array<i32>} : memref<8x32xf32, #tpu.memory_space<vmem>>, vector<8x32xf32>,
    return
  }
}

</mosaic_0001>

<bundles_post_ra>
// kernel: mlp_forward.1
= control target key start
LH: loop header
LB: loop body
LE: loop exit
PB: predicated region body
PF: predicated region fallthrough
CT: control target
= control target key end

     0   :  { %8 = vsyncpa [#allocation3], 0  ;;  %s1168_s0 = inlined_call_operand.vmem [shape: f32[16,128], index: 0, kind: input, shape index: {}]   ;;  %s1169_s1 = inlined_call_operand.hbm [shape: bf16[5,128,128], index: 1, kind: input, shape index: {}]   ;;  %s1170_s2 = inlined_call_operand.vmem [shape: f32[5,1,128], index: 2, kind: input, shape index: {}]   ;;  %s1171_s3 = inlined_call_operand.hbm [shape: f32[8,32], index: 3, kind: output, shape index: {}]  }
   0x1   :  { %9 = vsyncpa [#allocation4], 0  ;;  %s1047_s12 = smov [#allocation2]   ;;  %s999_s16 = scalar_lea.hbm %s1169_s1, 5120 }
   0x2   :  { %s17_s13 = sshll.u32 %s1047_s12, 4  ;;  %p1000_p0 = scmp.ne.s32.totalorder %s1169_s1, %s999_s16  ;;  %s18_s13 = int_to_ptr.vmem [resolvable:$true] %s17_s13 }
   0x3   :  { %p1003_p1 = scmp.lt.u32.totalorder %s999_s16, %s1169_s1 }
   0x5   :  { %p1005_p2 = pnand %p1003_p1, %p1000_p0 }
   0x7   :  { %1008 = shalt.err (!%p1005_p2)
}
   0x8   :  { %s1009_s21 = scalar_lea.vmem %s18_s13, 5120  ;;  %p1014_p4 = scmp.lt.s32.totalorder %s18_s13, %s18_s13 }
   0x9   :  { %p1010_p3 = scmp.ne.s32.totalorder %s18_s13, %s1009_s21  ;;  %p1015_p5 = scmp.lt.s32.totalorder %s1009_s21, %s1009_s21 }
   0xb   :  { %p1016_p6 = por %p1015_p5, %p1014_p4 }
   0xd   :  { %p1017_p7 = pnand %p1016_p6, %p1010_p3 }
   0xf   :  { %1020 = shalt.err (!%p1017_p7)
}
  0x10   :  { %s1048_s22 = smov 64   ;;  %s1049_s23 = smov 4  }
  0x11   :  { %23 = dma.hbm_to_vmem [thread:$0]  %s1169_s1, 5120, %s18_s13, [#allocation3], %s1048_s22, %s1048_s22, %s1049_s23  }
  0x12   :  { %1043 = dma.done.wait [#allocation3], 5120  }
  0x13   :  { %1044 = vsyncadd [#allocation3], 4294962176  ;;  %v1050_v0 = vmov 0.0   ;;  %vm1051_vm0 = vmmov 0   ;;  %v951_v1 = vld [vmem:[#allocation2] sm:$0xff]   ;;  %v952_v2 = vld [vmem:[#allocation2 + $0x8] sm:$0xff]  }
  0x14   :  { %845 = vmatprep.subr.bf16.mxu0 %v1050_v0  ;;  %861 = vmatprep.mubr.msk.bf16.mxu0 %vm1051_vm0, %v1050_v0  ;;  %v953_v3 = vld [vmem:[#allocation2 + $0x10] sm:$0xff]   ;;  %v954_v4 = vld [vmem:[#allocation2 + $0x18] sm:$0xff]   ;;  %v955_v5 = vld [vmem:[#allocation2 + $0x20] sm:$0xff]   ;;  %s1052_s11 = smov [#allocation5]   ;;  %vm734_vm1 = vcmask 261120  }
  0x15   :  { %865 = vmatprep.subr.bf16.mxu1 %v1050_v0  ;;  %881 = vmatprep.mubr.msk.bf16.mxu1 %vm1051_vm0, %v1050_v0  ;;  %v956_v6 = vld [vmem:[#allocation2 + $0x28] sm:$0xff]   ;;  %v957_v7 = vld [vmem:[#allocation2 + $0x30] sm:$0xff]   ;;  %v958_v8 = vld [vmem:[#allocation2 + $0x38] sm:$0xff]   ;;  %s742_s12 = sshll.u32 %s1052_s11, 4  ;;  %s743_s12 = int_to_ptr.vmem [resolvable:$true] %s742_s12 }
  0x16   :  { %846 = vmatpush3.bf16.msra.mxu0 %v951_v1  ;;  %v30_v9 = vld [vmem:[%s1168_s0] sm:$0xff]  ;;  %v31_v10 = vld [vmem:[%s1168_s0 + $0x8] sm:$0xff]  ;;  %v959_v12 = vld [vmem:[#allocation2 + $0x40] sm:$0xff]   ;;  %s1021_s13 = scalar_lea.vmem %s743_s12, 128  ;;  %p1026_p9 = scmp.lt.s32.totalorder %s743_s12, %s743_s12 }
  0x17   :  { %847 = vmatprep.subr.bf16.mxu0 %v1050_v0  ;;  %v41_v11 = vpack.c.bf16 %v31_v10, %v30_v9  ;;  %866 = vmatpush3.bf16.msra.mxu1 %v959_v12  ;;  %v960_v13 = vld [vmem:[#allocation2 + $0x48] sm:$0xff]   ;;  %v961_v14 = vld [vmem:[#allocation2 + $0x50] sm:$0xff]   ;;  %v962_v15 = vld [vmem:[#allocation2 + $0x58] sm:$0xff]   ;;  %p1022_p8 = scmp.ne.s32.totalorder %s743_s12, %s1021_s13  ;;  %p1027_p10 = scmp.lt.s32.totalorder %s1021_s13, %s1021_s13 }
  0x18   :  { %867 = vmatprep.subr.bf16.mxu1 %v1050_v0  ;;  %v963_v16 = vld [vmem:[#allocation2 + $0x60] sm:$0xff]   ;;  %v964_v17 = vld [vmem:[#allocation2 + $0x68] sm:$0xff]   ;;  %v965_v18 = vld [vmem:[#allocation2 + $0x70] sm:$0xff]  }
  0x19   :  { %v966_v19 = vld [vmem:[#allocation2 + $0x78] sm:$0xff]   ;;  %v751_v20 = vld [vmem:[%s1170_s2] ss:$0 sm:$0xff]  ;;  %v967_v56 = vld [vmem:[#allocation2 + $0x80] sm:$0xff]   ;;  %p1028_p11 = por %p1027_p10, %p1026_p9 }
  0x1a   :  { %848 = vmatpush3.bf16.msra.mxu0 %v952_v2  ;;  %v968_v57 = vld [vmem:[#allocation2 + $0x88] sm:$0xff]   ;;  %v969_v58 = vld [vmem:[#allocation2 + $0x90] sm:$0xff]   ;;  %v970_v59 = vld [vmem:[#allocation2 + $0x98] sm:$0xff]  }
  0x1b   :  { %849 = vmatprep.subr.bf16.mxu0 %v1050_v0  ;;  %868 = vmatpush3.bf16.msra.mxu1 %v960_v13  ;;  %v971_v60 = vld [vmem:[#allocation2 + $0xa0] sm:$0xff]   ;;  %v972_v61 = vld [vmem:[#allocation2 + $0xa8] sm:$0xff]   ;;  %v973_v62 = vld [vmem:[#allocation2 + $0xb0] sm:$0xff]   ;;  %p1029_p12 = pnand %p1028_p11, %p1022_p8 }
  0x1c   :  { %869 = vmatprep.subr.bf16.mxu1 %v1050_v0  ;;  %v974_v63 = vld [vmem:[#allocation2 + $0xb8] sm:$0xff]   ;;  %v761_v1 = vld [vmem:[%s1170_s2 + $0x1] ss:$0 sm:$0xff] }
  0x1e   :  { %850 = vmatpush3.bf16.msra.mxu0 %v953_v3 }
  0x1f   :  { %851 = vmatprep.subr.bf16.mxu0 %v1050_v0  ;;  %870 = vmatpush3.bf16.msra.mxu1 %v961_v14 }
  0x20   :  { %871 = vmatprep.subr.bf16.mxu1 %v1050_v0 }
  0x22   :  { %852 = vmatpush3.bf16.msra.mxu0 %v954_v4 }
  0x23   :  { %853 = vmatprep.subr.bf16.mxu0 %v1050_v0  ;;  %872 = vmatpush3.bf16.msra.mxu1 %v962_v15 }
  0x24   :  { %873 = vmatprep.subr.bf16.mxu1 %v1050_v0 }
  0x26   :  { %854 = vmatpush3.bf16.msra.mxu0 %v955_v5 }
  0x27   :  { %855 = vmatprep.subr.bf16.mxu0 %v1050_v0  ;;  %874 = vmatpush3.bf16.msra.mxu1 %v963_v16 }
  0x28   :  { %875 = vmatprep.subr.bf16.mxu1 %v1050_v0 }
  0x2a   :  { %856 = vmatpush3.bf16.msra.mxu0 %v956_v6 }
  0x2b   :  { %857 = vmatprep.subr.bf16.mxu0 %v1050_v0  ;;  %876 = vmatpush3.bf16.msra.mxu1 %v964_v17 }
  0x2c   :  { %877 = vmatprep.subr.bf16.mxu1 %v1050_v0 }
  0x2e   :  { %858 = vmatpush3.bf16.msra.mxu0 %v957_v7 }
  0x2f   :  { %859 = vmatprep.subr.bf16.mxu0 %v1050_v0  ;;  %878 = vmatpush3.bf16.msra.mxu1 %v965_v18 }
  0x30   :  { %879 = vmatprep.subr.bf16.mxu1 %v1050_v0 }
  0x32   :  { %860 = vmatpush3.bf16.msra.mxu0 %v958_v8 }
  0x33   :  { %885 = vmatprep.subr.bf16.mxu0 %v1050_v0  ;;  %880 = vmatpush3.bf16.msra.mxu1 %v966_v19 }
  0x34   :  { %905 = vmatprep.subr.bf16.mxu1 %v1050_v0 }
  0x35   :  { %862 = vmatmul.mubr.bf16.vlgmr.msra.gmra.mrb[0].mxu0 %v41_v11 }
  0x36   :  { %901 = vmatprep.mubr.msk.bf16.mxu0 %vm1051_vm0, %v1050_v0  ;;  %886 = vmatpush3.bf16.msra.mxu0 %v967_v56 }
  0x37   :  { %887 = vmatprep.subr.bf16.mxu0 %v1050_v0 }
  0x3a   :  { %888 = vmatpush3.bf16.msra.mxu0 %v968_v57 }
  0x3b   :  { %889 = vmatprep.subr.bf16.mxu0 %v1050_v0 }
  0x3e   :  { %890 = vmatpush3.bf16.msra.mxu0 %v969_v58 }
  0x3f   :  { %891 = vmatprep.subr.bf16.mxu0 %v1050_v0 }
  0x42   :  { %892 = vmatpush3.bf16.msra.mxu0 %v970_v59 }
  0x43   :  { %893 = vmatprep.subr.bf16.mxu0 %v1050_v0 }
  0x46   :  { %894 = vmatpush3.bf16.msra.mxu0 %v971_v60 }
  0x47   :  { %895 = vmatprep.subr.bf16.mxu0 %v1050_v0 }
  0x4a   :  { %896 = vmatpush3.bf16.msra.mxu0 %v972_v61 }
  0x4b   :  { %897 = vmatprep.subr.bf16.mxu0 %v1050_v0 }
  0x4e   :  { %898 = vmatpush3.bf16.msra.mxu0 %v973_v62 }
  0x4f   :  { %899 = vmatprep.subr.bf16.mxu0 %v1050_v0 }
  0x52   :  { %900 = vmatpush3.bf16.msra.mxu0 %v974_v63 }
  0x53   :  { %925 = vmatprep.subr.bf16.mxu0 %v1050_v0 }
 0x108   :  { %v147_v21 = vpop.f32.mrb[0].mxu0 }
 0x109   :  { %v863_v22 = vpop.f32.mrb[1].mxu0  ;;  %v148_v24 = vadd.f32 %v751_v20, %v147_v21 }
 0x10a   :  { %v150_v23 = vpop.f32.mrb[2].mxu0 }
 0x10b   :  { %v151_v25 = vadd.f32 %v751_v20, %v150_v23  ;;  %v864_v26 = vpop.f32.mrb[3].mxu0  ;;  %v154_v28 = vmax.f32 %v148_v24, 0.0 }
 0x10d   :  { %v155_v27 = vmax.f32 %v151_v25, 0.0 }
 0x10f   :  { %v157_v29 = vmul.f32 0.0, %v155_v27 }
 0x111   :  { %v158_v30 = vadd.f32 %v157_v29, %v154_v28 }
 0x113   :  { %v159_v31 = vrot.slane %v158_v30, 4 }
 0x115   :  { %v160_v32 = vadd.f32 %v159_v31, %v158_v30 }
 0x117   :  { %v161_v33 = vrot.slane %v160_v32, 2 }
 0x119   :  { %v162_v34 = vadd.f32 %v161_v33, %v160_v32 }
 0x11b   :  { %v163_v35 = vrot.slane %v162_v34, 1 }
 0x11d   :  { %v164_v36 = vadd.f32 %v163_v35, %v162_v34 }
 0x11f   :  { %v165_v37 = vmul.f32 0.125, %v164_v36 }
 0x121   :  { %v166_v38 = vsub.f32 %v154_v28, %v165_v37  ;;  %v167_v39 = vsub.f32 %v157_v29, %v165_v37  ;;  %v975_v37 = vld [vmem:[#allocation2 + $0xc0] sm:$0xff]  }
 0x123   :  { %v169_v40 = vmul.f32 0.0, %v167_v39  ;;  %v170_v41 = vmul.f32 %v166_v38, %v166_v38  ;;  %v977_v39 = vld [vmem:[#allocation2 + $0xd0] sm:$0xff]  }
 0x125   :  { %v171_v42 = vmul.f32 %v169_v40, %v169_v40 }
 0x127   :  { %v172_v43 = vadd.f32 %v171_v42, %v170_v41  ;;  %v979_v41 = vld [vmem:[#allocation2 + $0xe0] sm:$0xff]   ;;  %v980_v42 = vld [vmem:[#allocation2 + $0xe8] sm:$0xff]  }
 0x129   :  { %v173_v44 = vrot.slane %v172_v43, 4 }
 0x12b   :  { %v174_v45 = vadd.f32 %v173_v44, %v172_v43  ;;  %v981_v43 = vld [vmem:[#allocation2 + $0xf0] sm:$0xff]   ;;  %v982_v44 = vld [vmem:[#allocation2 + $0xf8] sm:$0xff]  }
 0x12d   :  { %v175_v46 = vrot.slane %v174_v45, 2 }
 0x12f   :  { %v176_v47 = vadd.f32 %v175_v46, %v174_v45  ;;  %v771_v45 = vld [vmem:[%s1170_s2 + $0x2] ss:$0 sm:$0xff] }
 0x131   :  { %v177_v48 = vrot.slane %v176_v47, 1 }
 0x133   :  { %v178_v49 = vadd.f32 %v177_v48, %v176_v47 }
 0x135   :  { %v179_v50 = vmul.f32 0.125, %v178_v49 }
 0x137   :  { %v180_v51 = vadd.f32 1e-05, %v179_v50 }
 0x139   :  { %991 = vrsqrt.f32 %v180_v51 }
 0x143   :  { %v992_v52 = vpop.eup %991 }
 0x144   :  { %v182_v53 = vmul.f32 %v992_v52, %v166_v38  ;;  %v183_v54 = vmul.f32 %v992_v52, %v169_v40  ;;  %v976_v38 = vld [vmem:[#allocation2 + $0xc8] sm:$0xff]   ;;  %v978_v40 = vld [vmem:[#allocation2 + $0xd8] sm:$0xff]  }
 0x146   :  { %v184_v55 = vpack.c.bf16 %v183_v54, %v182_v53 }
 0x148   :  { %882 = vmatmul.mubr.bf16.vlgmr.msra.gmra.mrb[0].mxu1 %v184_v55 }
 0x149   :  { %921 = vmatprep.mubr.msk.bf16.mxu1 %vm1051_vm0, %v1050_v0  ;;  %906 = vmatpush3.bf16.msra.mxu1 %v975_v37 }
 0x14a   :  { %907 = vmatprep.subr.bf16.mxu1 %v1050_v0 }
 0x14d   :  { %908 = vmatpush3.bf16.msra.mxu1 %v976_v38 }
 0x14e   :  { %909 = vmatprep.subr.bf16.mxu1 %v1050_v0 }
 0x151   :  { %910 = vmatpush3.bf16.msra.mxu1 %v977_v39 }
 0x152   :  { %911 = vmatprep.subr.bf16.mxu1 %v1050_v0 }
 0x155   :  { %912 = vmatpush3.bf16.msra.mxu1 %v978_v40 }
 0x156   :  { %913 = vmatprep.subr.bf16.mxu1 %v1050_v0 }
 0x159   :  { %914 = vmatpush3.bf16.msra.mxu1 %v979_v41 }
 0x15a   :  { %915 = vmatprep.subr.bf16.mxu1 %v1050_v0 }
 0x15d   :  { %916 = vmatpush3.bf16.msra.mxu1 %v980_v42 }
 0x15e   :  { %917 = vmatprep.subr.bf16.mxu1 %v1050_v0 }
 0x161   :  { %918 = vmatpush3.bf16.msra.mxu1 %v981_v43 }
 0x162   :  { %919 = vmatprep.subr.bf16.mxu1 %v1050_v0 }
 0x165   :  { %920 = vmatpush3.bf16.msra.mxu1 %v982_v44 }
 0x21b   :  { %v292_v2 = vpop.f32.mrb[0].mxu1 }
 0x21c   :  { %v883_v3 = vpop.f32.mrb[1].mxu1  ;;  %v293_v5 = vadd.f32 %v761_v1, %v292_v2 }
 0x21d   :  { %v295_v4 = vpop.f32.mrb[2].mxu1 }
 0x21e   :  { %v296_v6 = vadd.f32 %v761_v1, %v295_v4  ;;  %v884_v7 = vpop.f32.mrb[3].mxu1  ;;  %v299_v9 = vmax.f32 %v293_v5, 0.0 }
 0x220   :  { %v300_v8 = vmax.f32 %v296_v6, 0.0 }
 0x222   :  { %v302_v10 = vmul.f32 0.0, %v300_v8 }
 0x224   :  { %v303_v11 = vadd.f32 %v302_v10, %v299_v9 }
 0x226   :  { %v304_v12 = vrot.slane %v303_v11, 4 }
 0x228   :  { %v305_v13 = vadd.f32 %v304_v12, %v303_v11 }
 0x22a   :  { %v306_v14 = vrot.slane %v305_v13, 2 }
 0x22c   :  { %v307_v15 = vadd.f32 %v306_v14, %v305_v13 }
 0x22e   :  { %v308_v16 = vrot.slane %v307_v15, 1 }
 0x230   :  { %v309_v17 = vadd.f32 %v308_v16, %v307_v15 }
 0x232   :  { %v310_v18 = vmul.f32 0.125, %v309_v17 }
 0x234   :  { %v311_v19 = vsub.f32 %v299_v9, %v310_v18  ;;  %v312_v20 = vsub.f32 %v302_v10, %v310_v18  ;;  %v983_v18 = vld [vmem:[#allocation2 + $0x100] sm:$0xff]  }
 0x236   :  { %v314_v21 = vmul.f32 0.0, %v312_v20  ;;  %v315_v22 = vmul.f32 %v311_v19, %v311_v19  ;;  %v985_v20 = vld [vmem:[#allocation2 + $0x110] sm:$0xff]  }
 0x238   :  { %v316_v23 = vmul.f32 %v314_v21, %v314_v21 }
 0x23a   :  { %v317_v24 = vadd.f32 %v316_v23, %v315_v22  ;;  %v987_v22 = vld [vmem:[#allocation2 + $0x120] sm:$0xff]   ;;  %v988_v23 = vld [vmem:[#allocation2 + $0x128] sm:$0xff]  }
 0x23c   :  { %v318_v25 = vrot.slane %v317_v24, 4 }
 0x23e   :  { %v319_v26 = vadd.f32 %v318_v25, %v317_v24  ;;  %v989_v24 = vld [vmem:[#allocation2 + $0x130] sm:$0xff]   ;;  %v990_v25 = vld [vmem:[#allocation2 + $0x138] sm:$0xff]  }
 0x240   :  { %v320_v27 = vrot.slane %v319_v26, 2 }
 0x242   :  { %v321_v28 = vadd.f32 %v320_v27, %v319_v26  ;;  %v781_v26 = vld [vmem:[%s1170_s2 + $0x3] ss:$0 sm:$0xff] }
 0x244   :  { %v322_v29 = vrot.slane %v321_v28, 1 }
 0x246   :  { %v323_v30 = vadd.f32 %v322_v29, %v321_v28 }
 0x248   :  { %v324_v31 = vmul.f32 0.125, %v323_v30 }
 0x24a   :  { %v325_v32 = vadd.f32 1e-05, %v324_v31 }
 0x24c   :  { %993 = vrsqrt.f32 %v325_v32 }
 0x256   :  { %v994_v33 = vpop.eup %993 }
 0x257   :  { %v328_v34 = vmul.f32 %v994_v33, %v314_v21  ;;  %v327_v35 = vmul.f32 %v994_v33, %v311_v19  ;;  %v984_v19 = vld [vmem:[#allocation2 + $0x108] sm:$0xff]   ;;  %v986_v21 = vld [vmem:[#allocation2 + $0x118] sm:$0xff]  }
 0x259   :  { %v329_v36 = vpack.c.bf16 %v328_v34, %v327_v35 }
 0x25b   :  { %902 = vmatmul.mubr.bf16.vlgmr.msra.gmra.mrb[4].mxu0 %v329_v36 }
 0x25c   :  { %941 = vmatprep.mubr.msk.bf16.mxu0 %vm1051_vm0, %v1050_v0  ;;  %926 = vmatpush3.bf16.msra.mxu0 %v983_v18 }
 0x25d   :  { %927 = vmatprep.subr.bf16.mxu0 %v1050_v0 }
 0x260   :  { %928 = vmatpush3.bf16.msra.mxu0 %v984_v19 }
 0x261   :  { %929 = vmatprep.subr.bf16.mxu0 %v1050_v0 }
 0x264   :  { %930 = vmatpush3.bf16.msra.mxu0 %v985_v20 }
 0x265   :  { %931 = vmatprep.subr.bf16.mxu0 %v1050_v0 }
 0x268   :  { %932 = vmatpush3.bf16.msra.mxu0 %v986_v21 }
 0x269   :  { %933 = vmatprep.subr.bf16.mxu0 %v1050_v0 }
 0x26c   :  { %934 = vmatpush3.bf16.msra.mxu0 %v987_v22 }
 0x26d   :  { %935 = vmatprep.subr.bf16.mxu0 %v1050_v0 }
 0x270   :  { %936 = vmatpush3.bf16.msra.mxu0 %v988_v23 }
 0x271   :  { %937 = vmatprep.subr.bf16.mxu0 %v1050_v0 }
 0x274   :  { %938 = vmatpush3.bf16.msra.mxu0 %v989_v24 }
 0x275   :  { %939 = vmatprep.subr.bf16.mxu0 %v1050_v0 }
 0x278   :  { %940 = vmatpush3.bf16.msra.mxu0 %v990_v25 }
 0x32e   :  { %v437_v46 = vpop.f32.mrb[4].mxu0 }
 0x32f   :  { %v903_v47 = vpop.f32.mrb[5].mxu0  ;;  %v438_v49 = vadd.f32 %v771_v45, %v437_v46 }
 0x330   :  { %v440_v48 = vpop.f32.mrb[6].mxu0 }
 0x331   :  { %v441_v50 = vadd.f32 %v771_v45, %v440_v48  ;;  %v904_v51 = vpop.f32.mrb[7].mxu0  ;;  %v444_v53 = vmax.f32 %v438_v49, 0.0 }
 0x333   :  { %v445_v52 = vmax.f32 %v441_v50, 0.0 }
 0x335   :  { %v447_v54 = vmul.f32 0.0, %v445_v52 }
 0x337   :  { %v448_v55 = vadd.f32 %v447_v54, %v444_v53 }
 0x339   :  { %v449_v56 = vrot.slane %v448_v55, 4 }
 0x33b   :  { %v450_v57 = vadd.f32 %v449_v56, %v448_v55 }
 0x33d   :  { %v451_v58 = vrot.slane %v450_v57, 2 }
 0x33f   :  { %v452_v59 = vadd.f32 %v451_v58, %v450_v57 }
 0x341   :  { %v453_v60 = vrot.slane %v452_v59, 1 }
 0x343   :  { %v454_v61 = vadd.f32 %v453_v60, %v452_v59 }
 0x345   :  { %v455_v62 = vmul.f32 0.125, %v454_v61  ;;  %v791_v61 = vld [vmem:[%s1170_s2 + $0x4] ss:$0 sm:$0xff] }
 0x347   :  { %v456_v63 = vsub.f32 %v444_v53, %v455_v62  ;;  %v457_v1 = vsub.f32 %v447_v54, %v455_v62 }
 0x349   :  { %v459_v2 = vmul.f32 0.0, %v457_v1  ;;  %v460_v3 = vmul.f32 %v456_v63, %v456_v63 }
 0x34b   :  { %v461_v4 = vmul.f32 %v459_v2, %v459_v2 }
 0x34d   :  { %v462_v5 = vadd.f32 %v461_v4, %v460_v3 }
 0x34f   :  { %v463_v6 = vrot.slane %v462_v5, 4 }
 0x351   :  { %v464_v7 = vadd.f32 %v463_v6, %v462_v5 }
 0x353   :  { %v465_v8 = vrot.slane %v464_v7, 2 }
 0x355   :  { %v466_v9 = vadd.f32 %v465_v8, %v464_v7 }
 0x357   :  { %v467_v10 = vrot.slane %v466_v9, 1 }
 0x359   :  { %v468_v11 = vadd.f32 %v467_v10, %v466_v9 }
 0x35b   :  { %v469_v12 = vmul.f32 0.125, %v468_v11 }
 0x35d   :  { %v470_v13 = vadd.f32 1e-05, %v469_v12 }
 0x35f   :  { %995 = vrsqrt.f32 %v470_v13 }
 0x369   :  { %v996_v14 = vpop.eup %995 }
 0x36a   :  { %v473_v15 = vmul.f32 %v996_v14, %v459_v2  ;;  %v472_v16 = vmul.f32 %v996_v14, %v456_v63 }
 0x36c   :  { %v474_v17 = vpack.c.bf16 %v473_v15, %v472_v16 }
 0x36e   :  { %922 = vmatmul.mubr.bf16.vlgmr.msra.gmra.mrb[4].mxu1 %v474_v17 }
 0x441   :  { %v582_v27 = vpop.f32.mrb[4].mxu1 }
 0x442   :  { %v923_v28 = vpop.f32.mrb[5].mxu1  ;;  %v583_v30 = vadd.f32 %v781_v26, %v582_v27 }
 0x443   :  { %v585_v29 = vpop.f32.mrb[6].mxu1 }
 0x444   :  { %v586_v31 = vadd.f32 %v781_v26, %v585_v29  ;;  %v924_v32 = vpop.f32.mrb[7].mxu1  ;;  %v589_v34 = vmax.f32 %v583_v30, 0.0 }
 0x446   :  { %v590_v33 = vmax.f32 %v586_v31, 0.0 }
 0x448   :  { %v592_v35 = vmul.f32 0.0, %v590_v33 }
 0x44a   :  { %v593_v36 = vadd.f32 %v592_v35, %v589_v34 }
 0x44c   :  { %v594_v37 = vrot.slane %v593_v36, 4 }
 0x44e   :  { %v595_v38 = vadd.f32 %v594_v37, %v593_v36 }
 0x450   :  { %v596_v39 = vrot.slane %v595_v38, 2 }
 0x452   :  { %v597_v0 = vadd.f32 %v596_v39, %v595_v38 }
 0x454   :  { %v598_v40 = vrot.slane %v597_v0, 1 }
 0x456   :  { %v599_v41 = vadd.f32 %v598_v40, %v597_v0 }
 0x458   :  { %v600_v42 = vmul.f32 0.125, %v599_v41 }
 0x45a   :  { %v601_v43 = vsub.f32 %v589_v34, %v600_v42  ;;  %v602_v44 = vsub.f32 %v592_v35, %v600_v42 }
 0x45c   :  { %v604_v45 = vmul.f32 0.0, %v602_v44  ;;  %v605_v46 = vmul.f32 %v601_v43, %v601_v43 }
 0x45e   :  { %v606_v47 = vmul.f32 %v604_v45, %v604_v45 }
 0x460   :  { %v607_v48 = vadd.f32 %v606_v47, %v605_v46 }
 0x462   :  { %v608_v49 = vrot.slane %v607_v48, 4 }
 0x464   :  { %v609_v50 = vadd.f32 %v608_v49, %v607_v48 }
 0x466   :  { %v610_v51 = vrot.slane %v609_v50, 2 }
 0x468   :  { %v611_v52 = vadd.f32 %v610_v51, %v609_v50 }
 0x46a   :  { %v612_v53 = vrot.slane %v611_v52, 1 }
 0x46c   :  { %v613_v54 = vadd.f32 %v612_v53, %v611_v52 }
 0x46e   :  { %v614_v55 = vmul.f32 0.125, %v613_v54 }
 0x470   :  { %v615_v56 = vadd.f32 1e-05, %v614_v55 }
 0x472   :  { %997 = vrsqrt.f32 %v615_v56 }
 0x47c   :  { %v998_v57 = vpop.eup %997 }
 0x47d   :  { %v618_v58 = vmul.f32 %v998_v57, %v604_v45  ;;  %v617_v59 = vmul.f32 %v998_v57, %v601_v43 }
 0x47f   :  { %v619_v60 = vpack.c.bf16 %v618_v58, %v617_v59 }
 0x481   :  { %942 = vmatmul.mubr.bf16.vlgmr.msra.gmra.mrb[8].mxu0 %v619_v60 }
 0x554   :  { %v727_v62 = vpop.f32.mrb[8].mxu0 }
 0x555   :  { %v728_v63 = vadd.f32 %v791_v61, %v727_v62  ;;  %v943_v1 = vpop.f32.mrb[9].mxu0 }
 0x556   :  { %v730_v2 = vpop.f32.mrb[10].mxu0 }
 0x557   :  { %v733_v3 = vmax.f32 %v728_v63, 0.0  ;;  %v944_v4 = vpop.f32.mrb[11].mxu0 }
 0x559   :  { %735 = vst.msk [vmem:[#allocation5] sm:$0xff] %vm734_vm1, %v733_v3 }
 0x55a   :  { %1032 = shalt.err (!%p1029_p12)
}
 0x55b   :  { %s1033_s15 = scalar_lea.hbm %s1171_s3, 128 }
 0x55c   :  { %p1034_p13 = scmp.ne.s32.totalorder %s1171_s3, %s1033_s15  ;;  %p1037_p0 = scmp.lt.u32.totalorder %s1033_s15, %s1171_s3 }
 0x55e   :  { %p1039_p1 = pnand %p1037_p0, %p1034_p13 }
 0x560   :  { %1042 = shalt.err (!%p1039_p1)
}
 0x561   :  { %745 = dma.vmem_to_hbm [thread:$0]  %s743_s12, 128, %s1171_s3, [#allocation4]  }
 0x562   :  { %1045 = dma.done.wait [#allocation4], 128  }
 0x563   :  { %1046 = vsyncadd [#allocation4], 4294967168 }
 0x564   :  { %749 = vsyncpa [#allocation3], 1 }
 0x565   :  { %750 = vsyncpa [#allocation4], 1 }

</bundles_post_ra>
